<compile_context>
chip_gen: v6e
topology: v6e:2x2x1
jax: 0.10.0
libtpu: 0.0.40
codegen_flags: <defaults>
</compile_context>

<pallas_src>
import jax
import jax.numpy as jnp
from jax.experimental import pallas as pl
from jax.experimental.pallas import tpu as pltpu


def _conv1x1_kernel(x_ref, w_ref, b_ref, o_ref):
    # x_ref: (nb, C_in, tL), w_ref: (tCo, C_in), b_ref: (tCo, 1),
    # o_ref: (nb, tCo, tL).  nb is a small static constant -> unrolled loop of
    # lane-dense MXU matmuls; each store targets a (tCo, tL) slab.
    w = w_ref[...]
    b = b_ref[...]
    for i in range(x_ref.shape[0]):
        acc = jnp.dot(w, x_ref[i], preferred_element_type=jnp.float32)
        o_ref[i] = (acc + b).astype(o_ref.dtype)


def _vmem_capacity_bytes() -> int:
    """Physical VMEM of the current chip (fallback: 64 MiB, the v7x minimum)."""
    try:
        return int(pltpu.get_tpu_info().vmem_capacity_bytes)
    except Exception:
        return 64 * 1024 * 1024


def _plan_tiles(n, c_in, c_out, length, itemsize):
    """Pick (nb, tl, tco, vmem_limit_bytes) sized against the chip's VMEM."""
    vmem_phys = _vmem_capacity_bytes()
    tile_budget = int(vmem_phys * 0.6)        # leave headroom for Mosaic scratch

    # Lane-dense L tile, as large as practical (amortize per-step overhead).
    if length < 128:
        tl = length                            # full-extent block (legal)
    else:
        tl = min((length // 128) * 128, 8192)  # 128-multiple; last block masked

    # Tile C_out only when the full weight would crowd VMEM (matters on v7x).
    w_full_bytes = c_out * c_in * itemsize
    if w_full_bytes > 8 * 1024 * 1024:
        tco = (4 * 1024 * 1024 // max(c_in * itemsize, 1)) // 128 * 128
        tco = max(128, min(tco, c_out))
    else:
        tco = c_out

    def footprint(nb_, tl_):
        x_b = nb_ * c_in * tl_ * itemsize
        o_b = nb_ * tco * tl_ * itemsize
        w_b = tco * c_in * itemsize
        b_b = tco * itemsize
        return 2 * (x_b + o_b + w_b + b_b)     # double-buffered everything

    # Batch-fuse rows until each step moves >= ~1 MiB of x+out HBM traffic.
    target = 1 << 20
    nb = 1
    while (nb < n
           and nb * (c_in + tco) * tl * itemsize < target
           and footprint(2 * nb, tl) <= tile_budget):
        nb *= 2
    nb = min(nb, n)

    # Shrink if the tiles still exceed the budget (huge channels / long L).
    while footprint(nb, tl) > tile_budget and nb > 1:
        nb = max(1, nb // 2)
    while footprint(nb, tl) > tile_budget and tl > 128:
        tl = max(128, ((tl // 2) // 128) * 128)
    # TODO(synk): if C_in alone ever blows the budget, add a C_in reduction
    # grid axis ("arbitrary", last) with a VMEM f32 accumulator instead of
    # shrinking the lane-dense L tile.

    vmem_limit = min(vmem_phys, max(footprint(nb, tl) + (4 << 20), 16 << 20))
    return nb, tl, tco, int(vmem_limit)


def linear_trans_forward(x_ncl, weight, bias):
    """Conv1d(kernel_size=1) forward.

    x_ncl:  (N, C_in, L)  float32  -- PyTorch NCL layout
    weight: (C_out, C_in, 1)       -- PyTorch Conv1d weight layout
    bias:   (C_out,)
    returns (N, C_out, L)
    """
    n, c_in, length = x_ncl.shape
    c_out = weight.shape[0]
    itemsize = jnp.dtype(x_ncl.dtype).itemsize

    # Tiny parameter reshapes only (no full-tensor transposes).
    w2d = weight[:, :, 0]                 # (C_out, C_in)
    b2d = bias.reshape(c_out, 1)          # (C_out, 1), broadcasts over L

    nb, tl, tco, vmem_limit = _plan_tiles(n, c_in, c_out, length, itemsize)
    num_b = pl.cdiv(n, nb)
    num_l = pl.cdiv(length, tl)
    num_o = pl.cdiv(c_out, tco)

    cost = pl.CostEstimate(
        flops=2 * n * length * c_in * c_out,
        transcendentals=0,
        bytes_accessed=(num_o * n * c_in * length + n * c_out * length
                        + c_out * c_in + c_out) * itemsize,
    )

    if num_o == 1:
        # Whole weight + bias VMEM-resident (constant block index).
        grid = (num_l, num_b)
        in_specs = [
            pl.BlockSpec((nb, c_in, tl), lambda l, b: (b, 0, l)),
            pl.BlockSpec((c_out, c_in), lambda l, b: (0, 0)),
            pl.BlockSpec((c_out, 1), lambda l, b: (0, 0)),
        ]
        out_specs = pl.BlockSpec((nb, c_out, tl), lambda l, b: (b, 0, l))
        semantics = ("parallel", "parallel")
    else:
        # Large weight: tile C_out; o is the slowest axis so each weight tile
        # stays resident across the inner (l, b) iterations.
        grid = (num_o, num_l, num_b)
        in_specs = [
            pl.BlockSpec((nb, c_in, tl), lambda o, l, b: (b, 0, l)),
            pl.BlockSpec((tco, c_in), lambda o, l, b: (o, 0)),
            pl.BlockSpec((tco, 1), lambda o, l, b: (o, 0)),
        ]
        out_specs = pl.BlockSpec((nb, tco, tl), lambda o, l, b: (b, o, l))
        semantics = ("parallel", "parallel", "parallel")

    out = pl.pallas_call(
        _conv1x1_kernel,
        out_shape=jax.ShapeDtypeStruct((n, c_out, length), x_ncl.dtype),
        grid_spec=pltpu.PrefetchScalarGridSpec(
            num_scalar_prefetch=0,
            grid=grid,
            in_specs=in_specs,
            out_specs=out_specs,
        ),
        compiler_params=pltpu.CompilerParams(
            dimension_semantics=semantics,
            vmem_limit_bytes=vmem_limit,
        ),
        cost_estimate=cost,
    )(x_ncl, w2d, b2d)

    return out


def _reference(x_ncl, weight, bias):
    return jnp.einsum("ncl,oc->nol", x_ncl, weight[:, :, 0]) + bias[None, :, None]


if __name__ == "__main__":
    key = jax.random.PRNGKey(0)
    kx, kw, kb, kx2, kx3, kw3, kb3 = jax.random.split(key, 7)

    # --- Test 1: module-scale shapes (batch=2, in=8, out=16, L=16).
    n, c_in, c_out, length = 2, 8, 16, 16
    x = jax.random.normal(kx, (n, c_in, length), dtype=jnp.float32)
    # Deterministic params mimicking PyTorch Conv1d uniform(-1/sqrt(fan_in), ...)
    bound = 1.0 / (c_in ** 0.5)
    weight = jax.random.uniform(kw, (c_out, c_in, 1), dtype=jnp.float32,
                                minval=-bound, maxval=bound)
    bias = jax.random.uniform(kb, (c_out,), dtype=jnp.float32,
                              minval=-bound, maxval=bound)
    out = jax.block_until_ready(linear_trans_forward(x, weight, bias))
    ref = _reference(x, weight, bias)
    assert out.shape == (n, c_out, length)
    assert jnp.allclose(out, ref, atol=1e-5, rtol=1e-5)

    # --- Test 2: L not a multiple of 128 (partial last lane block, masked).
    length2 = 320
    x2 = jax.random.normal(kx2, (n, c_in, length2), dtype=jnp.float32)
    out2 = jax.block_until_ready(linear_trans_forward(x2, weight, bias))
    ref2 = _reference(x2, weight, bias)
    assert out2.shape == (n, c_out, length2)
    assert jnp.allclose(out2, ref2, atol=1e-5, rtol=1e-5)

    # --- Test 3: larger shapes exercising batch fusion + multi-block grid.
    n3, c_in3, c_out3, length3 = 4, 64, 128, 1024
    x3 = jax.random.normal(kx3, (n3, c_in3, length3), dtype=jnp.float32)
    bound3 = 1.0 / (c_in3 ** 0.5)
    weight3 = jax.random.uniform(kw3, (c_out3, c_in3, 1), dtype=jnp.float32,
                                 minval=-bound3, maxval=bound3)
    bias3 = jax.random.uniform(kb3, (c_out3,), dtype=jnp.float32,
                               minval=-bound3, maxval=bound3)
    out3 = jax.block_until_ready(linear_trans_forward(x3, weight3, bias3))
    ref3 = _reference(x3, weight3, bias3)
    assert out3.shape == (n3, c_out3, length3)
    assert jnp.allclose(out3, ref3, atol=1e-4, rtol=1e-4)

    print("KERNEL_OK")
</pallas_src>

<mosaic_0001>
module attributes {stable_mosaic.version = 11 : i64} {
  func.func @_conv1x1_kernel(%arg0: i32, %arg1: i32, %arg2: memref<2x8x16xf32, #tpu.memory_space<vmem>>, %arg3: memref<16x8xf32, #tpu.memory_space<vmem>>, %arg4: memref<16x1xf32, #tpu.memory_space<vmem>>, %arg5: memref<2x16x16xf32, #tpu.memory_space<vmem>>) attributes {dimension_semantics = [#tpu.dimension_semantics<parallel>, #tpu.dimension_semantics<parallel>], iteration_bounds = array<i64: 1, 1>, scalar_prefetch = 0 : i64, scratch_operands = 0 : i64, tpu.core_type = #tpu.core_type<tc>, window_params = [{transform_indices = @transform_0, window_bounds = array<i64: 2, 8, 16>}, {pipeline_mode = #tpu.pipeline_mode<synchronous>, transform_indices = @transform_1, window_bounds = array<i64: 16, 8>}, {pipeline_mode = #tpu.pipeline_mode<synchronous>, transform_indices = @transform_2, window_bounds = array<i64: 16, 1>}, {transform_indices = @transform_3, window_bounds = array<i64: 2, 16, 16>}]} {
    %c0 = arith.constant 0 : index
    %c0_0 = arith.constant 0 : index
    %0 = vector.load %arg3[%c0, %c0_0] : memref<16x8xf32, #tpu.memory_space<vmem>>, vector<16x8xf32>
    %c0_1 = arith.constant 0 : index
    %c0_2 = arith.constant 0 : index
    %1 = vector.load %arg4[%c0_1, %c0_2] : memref<16x1xf32, #tpu.memory_space<vmem>>, vector<16x1xf32>
    %c0_3 = arith.constant 0 : index
    %c0_4 = arith.constant 0 : index
    %c0_5 = arith.constant 0 : index
    %2 = vector.load %arg2[%c0_3, %c0_4, %c0_5] : memref<2x8x16xf32, #tpu.memory_space<vmem>>, vector<1x8x16xf32>
    %3 = vector.shape_cast %2 : vector<1x8x16xf32> to vector<8x16xf32>
    %cst = arith.constant dense<0.000000e+00> : vector<16x16xf32>
    %4 = tpu.matmul %0, %3, %cst {dimension_numbers = #tpu.dot_dimension_numbers<[1], [0], [0], [1], [0, 0, 1, 1], [], []>} : vector<16x8xf32>, vector<8x16xf32>, vector<16x16xf32> -> vector<16x16xf32>
    %5 = vector.broadcast %1 : vector<16x1xf32> to vector<16x16xf32>
    %6 = arith.addf %4, %5 : vector<16x16xf32>
    %c0_6 = arith.constant 0 : index
    %c0_7 = arith.constant 0 : index
    %c0_8 = arith.constant 0 : index
    %7 = vector.load %arg5[%c0_6, %c0_7, %c0_8] : memref<2x16x16xf32, #tpu.memory_space<vmem>>, vector<1x16x16xf32>
    %8 = vector.shape_cast %7 : vector<1x16x16xf32> to vector<16x16xf32>
    %9 = vector.shape_cast %6 : vector<16x16xf32> to vector<1x16x16xf32>
    tpu.vector_store %arg5[%c0_6, %c0_7, %c0_8], %9 {strides = array<i32>} : memref<2x16x16xf32, #tpu.memory_space<vmem>>, vector<1x16x16xf32>,
    %c1 = arith.constant 1 : index
    %c0_9 = arith.constant 0 : index
    %c0_10 = arith.constant 0 : index
    %10 = vector.load %arg2[%c1, %c0_9, %c0_10] : memref<2x8x16xf32, #tpu.memory_space<vmem>>, vector<1x8x16xf32>
    %11 = vector.shape_cast %10 : vector<1x8x16xf32> to vector<8x16xf32>
    %cst_11 = arith.constant dense<0.000000e+00> : vector<16x16xf32>
    %12 = tpu.matmul %0, %11, %cst_11 {dimension_numbers = #tpu.dot_dimension_numbers<[1], [0], [0], [1], [0, 0, 1, 1], [], []>} : vector<16x8xf32>, vector<8x16xf32>, vector<16x16xf32> -> vector<16x16xf32>
    %13 = vector.broadcast %1 : vector<16x1xf32> to vector<16x16xf32>
    %14 = arith.addf %12, %13 : vector<16x16xf32>
    %c1_12 = arith.constant 1 : index
    %c0_13 = arith.constant 0 : index
    %c0_14 = arith.constant 0 : index
    %15 = vector.load %arg5[%c1_12, %c0_13, %c0_14] : memref<2x16x16xf32, #tpu.memory_space<vmem>>, vector<1x16x16xf32>
    %16 = vector.shape_cast %15 : vector<1x16x16xf32> to vector<16x16xf32>
    %17 = vector.shape_cast %14 : vector<16x16xf32> to vector<1x16x16xf32>
    tpu.vector_store %arg5[%c1_12, %c0_13, %c0_14], %17 {strides = array<i32>} : memref<2x16x16xf32, #tpu.memory_space<vmem>>, vector<1x16x16xf32>,
    return
  }
  func.func @transform_0(%arg0: i32, %arg1: i32) -> (i32, i32, i32) {
    %c0_i32 = arith.constant 0 : i32
    %c0_i32_0 = arith.constant 0 : i32
    return %arg1, %c0_i32, %arg0 : i32, i32, i32
  }
  func.func @transform_1(%arg0: i32, %arg1: i32) -> (i32, i32) {
    %c0_i32 = arith.constant 0 : i32
    %c0_i32_0 = arith.constant 0 : i32
    %c0_i32_1 = arith.constant 0 : i32
    return %c0_i32, %c0_i32_0 : i32, i32
  }
  func.func @transform_2(%arg0: i32, %arg1: i32) -> (i32, i32) {
    %c0_i32 = arith.constant 0 : i32
    %c0_i32_0 = arith.constant 0 : i32
    %c0_i32_1 = arith.constant 0 : i32
    return %c0_i32, %c0_i32_0 : i32, i32
  }
  func.func @transform_3(%arg0: i32, %arg1: i32) -> (i32, i32, i32) {
    %c0_i32 = arith.constant 0 : i32
    %c0_i32_0 = arith.constant 0 : i32
    return %arg1, %c0_i32, %arg0 : i32, i32, i32
  }
}

</mosaic_0001>

<bundles_post_ra>
// kernel: tpu_custom_call.1
= control target key start
LH: loop header
LB: loop body
LE: loop exit
PB: predicated region body
PF: predicated region fallthrough
CT: control target
= control target key end

     0   :  { %vm30_vm0 = vcmask 64512   ;;  %s304_s0 = inlined_call_operand.vmem [shape: f32[2,8,16], index: 0, kind: input, shape index: {}]   ;;  %s305_s1 = inlined_call_operand.vmem [shape: f32[16,8], index: 1, kind: input, shape index: {}]   ;;  %s306_s2 = inlined_call_operand.vmem [shape: f32[16,1], index: 2, kind: input, shape index: {}]   ;;  %s307_s3 = inlined_call_operand.hbm [shape: f32[2,16,16], index: 3, kind: output, shape index: {}]  }
   0x1   :  { %v19_v0 = vld [vmem:[%s304_s0] sm:$0xff]  ;;  %v213_v1 = vld [vmem:[%s304_s0 + $0x8] sm:$0xff] }
   0x2   :  { %v15_v2 = vld [vmem:[%s305_s1] sm:$0xff]  ;;  %222 = vmatprep.subr.mxu0 %v19_v0  ;;  %227 = vmatprep.subr.mxu1 %v213_v1  ;;  %v16_v3 = vld [vmem:[%s305_s1 + $0x8] sm:$0xff] }
   0x3   :  { %223 = vmatpush3.msra.mxu0 %v19_v0  ;;  %224 = vmatprep.mubr.msk.f32.mxu0 %vm30_vm0, %v15_v2 }
   0x4   :  { %8 = vsyncpa [#allocation3], 0  ;;  %228 = vmatpush3.msra.mxu1 %v213_v1  ;;  %229 = vmatprep.mubr.msk.f32.mxu1 %vm30_vm0, %v15_v2  ;;  %v17_v4 = vld [vmem:[%s306_s2] sm:$0xff]  ;;  %v259_v5 = vmov 0   ;;  %v18_v6 = vld [vmem:[%s306_s2 + $0x8] sm:$0xff]  ;;  %s260_s1 = smov [#allocation2]  }
   0x5   :  { %225 = vmatmul.mubr.msk.f32.vlgmr.msra.gmra.mxu0 %vm30_vm0, %v16_v3  ;;  %230 = vmatmul.mubr.msk.f32.vlgmr.msra.gmra.mxu1 %vm30_vm0, %v16_v3  ;;  %s200_s23 = sshll.u32 %s260_s1, 4  ;;  %vm112_vm1 = vcmask 130048   ;;  %s201_s23 = int_to_ptr.vmem [resolvable:$true] %s200_s23 }
   0x6   :  { %236 = vset.pattern.permute.xlu0 %v259_v5  ;;  %s237_s2 = scalar_lea.vmem %s201_s23, 512  ;;  %p242_p1 = scmp.lt.s32.totalorder %s201_s23, %s201_s23 }
   0x7   :  { %22 = vperm.xlu0 %236, %v17_v4   ;;  %p238_p0 = scmp.ne.s32.totalorder %s201_s23, %s237_s2  ;;  %p243_p2 = scmp.lt.s32.totalorder %s237_s2, %s237_s2 }
   0x9   :  { %p244_p3 = por %p243_p2, %p242_p1 }
   0xb   :  { %27 = vperm.xlu0 %236, %v18_v6   ;;  %p245_p4 = pnand %p244_p3, %p238_p0 }
  0x82   :  { %v23_v7 = vpop.permute.xlu0 %22 }
  0x86   :  { %v28_v8 = vpop.permute.xlu0 %27 }
  0xc5   :  { %v226_v9 = vpop.f32.mrf.mxu0  ;;  %v231_v10 = vpop.f32.mrf.mxu1 }
  0xc6   :  { %v109_v11 = vadd.f32 %v226_v9, %v28_v8  ;;  %v189_v12 = vadd.f32 %v231_v10, %v28_v8 }
  0xc7   :  { %v103_v13 = vpop.f32.mrf.mxu0  ;;  %v183_v14 = vpop.f32.mrf.mxu1 }
  0xc8   :  { %114 = vst.msk [vmem:[#allocation2 + $0x8] sm:$0xff] %vm112_vm1, %v109_v11  ;;  %194 = vst.msk [vmem:[#allocation2 + $0x18] sm:$0xff] %vm112_vm1, %v189_v12  ;;  %v104_v15 = vadd.f32 %v103_v13, %v23_v7  ;;  %v184_v16 = vadd.f32 %v183_v14, %v23_v7 }
  0xca   :  { %113 = vst.msk [vmem:[#allocation2] sm:$0xff] %vm112_vm1, %v104_v15  ;;  %193 = vst.msk [vmem:[#allocation2 + $0x10] sm:$0xff] %vm112_vm1, %v184_v16 }
  0xcb   :  { %248 = shalt.err (!%p245_p4)
}
  0xcc   :  { %s261_s24 = smov 128   ;;  %s262_s25 = smov 8  }
  0xcd   :  { %206 = dma.vmem_to_hbm [thread:$0]  %s201_s23, 512, %s307_s3, [#allocation3], %s261_s24, %s261_s24, %s262_s25  }
  0xce   :  { %257 = dma.done.wait [#allocation3], 512  }
  0xcf   :  { %258 = vsyncadd [#allocation3], 4294966784 }
  0xd0   :  { %210 = vsyncpa [#allocation3], 1 }

</bundles_post_ra>
